<compile_context>
chip_gen: v7x
topology: tpu7x:2x2x1
jax: 0.10.0
libtpu: 0.0.40
codegen_flags: <defaults>
</compile_context>

<pallas_src>
import functools

import jax
import jax.numpy as jnp
from jax.experimental import pallas as pl
from jax.experimental.pallas import tpu as pltpu


def _round_up(x, m):
    return ((x + m - 1) // m) * m


def _sublane_min(dtype):
    return {4: 8, 2: 16, 1: 32}.get(jnp.dtype(dtype).itemsize, 8)


@functools.lru_cache(maxsize=None)
def _chip_budget():
    """(tb_max, tk_max, tn_max, vmem_soft_cap_bytes) tuned per TPU generation."""
    try:
        vmem_cap = int(pltpu.get_tpu_info().vmem_capacity_bytes)
    except Exception:
        vmem_cap = 64 << 20
    if vmem_cap >= (96 << 20):            # v5e / v6e: 128 MiB physical VMEM
        return 1024, 1024, 512, 96 << 20
    return 512, 512, 256, 48 << 20        # v7x: 64 MiB per TensorCore + headroom


@functools.lru_cache(maxsize=None)
def _tile_plan(K, O):
    """Static tile plan; depends only on the layer shape and the chip."""
    tb_max, tk_max, tn_max, vmem_cap = _chip_budget()
    if O >= 256:
        TN = min(tn_max, _round_up(O, 256))   # fill the 256-wide MXU on v6e/v7x
    else:
        TN = 128                              # lane-dense minimum for tiny O
    O_pad = _round_up(O, TN)
    TK = min(tk_max, _round_up(K, 128))
    K_pad = _round_up(K, TK)
    return TK, K_pad, TN, O_pad, tb_max, vmem_cap


# ----------------------------- kernels --------------------------------------

def _single_block_kernel(x_ref, w_ref, b_ref, o_ref):
    """Whole problem in one VMEM block: no grid, no accumulator."""
    o_ref[...] = (jnp.dot(x_ref[...], w_ref[...],
                          preferred_element_type=jnp.float32)
                  + b_ref[...]).astype(o_ref.dtype)


def _fused_kernel_f32(x_ref, w_ref, b_ref, o_ref):
    """f32 output: accumulate directly into the resident output block."""
    k = pl.program_id(2)

    @pl.when(k == 0)
    def _():
        o_ref[...] = jnp.broadcast_to(b_ref[...], o_ref.shape)

    o_ref[...] += jnp.dot(x_ref[...], w_ref[...],
                          preferred_element_type=jnp.float32)


def _fused_kernel_acc(x_ref, w_ref, b_ref, o_ref, acc_ref):
    """Non-f32 output: f32 VMEM accumulator, cast + store on the last K step."""
    k = pl.program_id(2)

    @pl.when(k == 0)
    def _():
        acc_ref[...] = jnp.broadcast_to(b_ref[...], acc_ref.shape)

    acc_ref[...] += jnp.dot(x_ref[...], w_ref[...],
                            preferred_element_type=jnp.float32)

    @pl.when(k == pl.num_programs(2) - 1)
    def _():
        o_ref[...] = acc_ref[...].astype(o_ref.dtype)


# ----------------------------- wrapper ---------------------------------------

def _prepare_params(w1, b1, w2, b2, dtype=jnp.float32):
    """Fuse the two linears into one (K_pad, O_pad) weight + (1, O_pad) bias.

    Done once, outside the per-call path (no per-forward transpose/concat/pad).
    """
    O, F1 = w1.shape
    K = F1 + w2.shape[1]
    _, K_pad, _, O_pad, _, _ = _tile_plan(K, O)
    w = jnp.concatenate([jnp.asarray(w1, dtype).T,
                         jnp.asarray(w2, dtype).T], axis=0)          # (K, O)
    wp = jnp.zeros((K_pad, O_pad), dtype).at[:K, :O].set(w)
    b = jnp.asarray(b1, jnp.float32) + jnp.asarray(b2, jnp.float32)
    bp = jnp.zeros((1, O_pad), jnp.float32).at[0, :O].set(b)
    return wp, bp


def _fused_linear_2d(xb, wp, bp, K, O, dtype):
    """xb: (B, K). wp: (K_pad, O_pad) pre-fused weight. bp: (1, O_pad) f32 bias."""
    B = xb.shape[0]
    K_pad, O_pad = wp.shape
    TK, _, TN, _, tb_max, vmem_cap = _tile_plan(K, O)
    itemsize = jnp.dtype(dtype).itemsize
    sub = _sublane_min(dtype)

    # Zero-pad K (padded columns contribute 0 to the accumulation). Batch is
    # rounded only up to the sublane minimum; junk rows are sliced off below.
    B_pad = _round_up(max(B, sub), sub)
    xb = jnp.asarray(xb, dtype)
    if B_pad != B or K_pad != K:
        xp = jnp.zeros((B_pad, K_pad), dtype).at[:B, :K].set(xb)
    else:
        xp = xb

    TB = min(tb_max, B_pad)
    nb = pl.cdiv(B_pad, TB)
    nk = K_pad // TK
    no = O_pad // TN

    # Tiny case (canonical 8x32x1 shape): one block, no grid, no accumulator,
    # no pl.when -> removes per-step (~0.35us) and init/finalize overhead.
    single_bytes = (B_pad * K_pad + K_pad * O_pad
                    + 2 * B_pad * O_pad) * itemsize + O_pad * 4
    if nb == 1 and nk == 1 and no == 1 and single_bytes <= (8 << 20):
        out = pl.pallas_call(
            _single_block_kernel,
            out_shape=jax.ShapeDtypeStruct((B_pad, O_pad), dtype),
        )(xp, wp, bp)
        return out[:B, :O]

    needs_scratch = jnp.dtype(dtype) != jnp.dtype(jnp.float32)
    kernel = _fused_kernel_acc if needs_scratch else _fused_kernel_f32
    scratch = [pltpu.VMEM((TB, TN), jnp.float32)] if needs_scratch else []

    cost = pl.CostEstimate(
        flops=2 * B_pad * K_pad * O_pad,
        transcendentals=0,
        bytes_accessed=(no * B_pad * K_pad * itemsize      # x re-streamed per N tile
                        + nb * K_pad * O_pad * itemsize    # W re-streamed per batch tile
                        + O_pad * 4
                        + B_pad * O_pad * itemsize),
    )

    vmem_bytes = ((2 * TB * TK + 2 * TK * TN + 2 * TB * TN) * itemsize
                  + 2 * TN * 4
                  + (TB * TN * 4 if needs_scratch else 0)
                  + (4 << 20))
    vmem_limit = int(min(max(vmem_bytes, 8 << 20), vmem_cap))

    out = pl.pallas_call(
        kernel,
        out_shape=jax.ShapeDtypeStruct((B_pad, O_pad), dtype),
        grid_spec=pltpu.PrefetchScalarGridSpec(
            num_scalar_prefetch=0,
            grid=(nb, no, nk),
            in_specs=[
                pl.BlockSpec((TB, TK), lambda i, j, k: (i, k)),
                pl.BlockSpec((TK, TN), lambda i, j, k: (k, j)),
                pl.BlockSpec((1, TN), lambda i, j, k: (0, j)),
            ],
            out_specs=pl.BlockSpec((TB, TN), lambda i, j, k: (i, j)),
            scratch_shapes=scratch,
        ),
        compiler_params=pltpu.CompilerParams(
            dimension_semantics=("parallel", "parallel", "arbitrary"),
            vmem_limit_bytes=vmem_limit,
        ),
        cost_estimate=cost,
    )(xp, wp, bp)
    return out[:B, :O]


def linear_with_submodule(x, w1, b1, w2, b2):
    """One-shot forward matching LinearWithSubmodule.forward."""
    *lead, K = x.shape
    O = w1.shape[0]
    dtype = x.dtype
    wp, bp = _prepare_params(w1, b1, w2, b2, dtype)
    y = _fused_linear_2d(x.reshape(-1, K), wp, bp, K, O, dtype)
    return y.reshape(*lead, O)


def make_linear_with_submodule(w1, b1, w2, b2, dtype=jnp.float32):
    """Prepare (fuse + transpose + pad) the weights ONCE; returns a jitted forward."""
    O, F1 = w1.shape
    K = F1 + w2.shape[1]
    wp, bp = _prepare_params(w1, b1, w2, b2, dtype)

    @jax.jit
    def forward(x):
        *lead, k_in = x.shape
        assert k_in == K
        y = _fused_linear_2d(x.reshape(-1, K).astype(dtype), wp, bp, K, O, dtype)
        return y.reshape(*lead, O)

    return forward


# ----------------------------- test harness ----------------------------------

def init_params(key, in_features, out_features=1):
    """Deterministic init mirroring nn.Linear(F1, O) / nn.Linear(F2, O)."""
    f1 = in_features // 2
    f2 = in_features - f1
    k1, k2, k3, k4 = jax.random.split(key, 4)
    bound1 = 1.0 / (f1 ** 0.5)
    bound2 = 1.0 / (f2 ** 0.5)
    w1 = jax.random.uniform(k1, (out_features, f1), jnp.float32, -bound1, bound1)
    b1 = jax.random.uniform(k2, (out_features,), jnp.float32, -bound1, bound1)
    w2 = jax.random.uniform(k3, (out_features, f2), jnp.float32, -bound2, bound2)
    b2 = jax.random.uniform(k4, (out_features,), jnp.float32, -bound2, bound2)
    return w1, b1, w2, b2


def _reference(x, w1, b1, w2, b2):
    f1 = w1.shape[1]
    hi = jax.lax.Precision.HIGHEST
    return (jnp.matmul(x[..., :f1], w1.T, precision=hi) + b1
            + jnp.matmul(x[..., f1:], w2.T, precision=hi) + b2)


if __name__ == "__main__":
    key = jax.random.PRNGKey(0)

    # Case 1: canonical small module shape, via the prepared/jitted factory
    # (exercises the single-block fast path).
    kx, kp = jax.random.split(key)
    B1, K1, O1 = 8, 32, 1
    x1 = jax.random.normal(kx, (B1, K1), jnp.float32)
    p1 = init_params(kp, K1, O1)
    fwd = make_linear_with_submodule(*p1)
    y1 = jax.block_until_ready(fwd(x1))
    r1 = _reference(x1, *p1)
    assert y1.shape == (B1, O1)
    assert jnp.allclose(y1, r1, atol=1e-4, rtol=1e-4), float(jnp.max(jnp.abs(y1 - r1)))

    # Case 2: non-aligned sizes (K padding + ragged batch, single tile).
    kx2, kp2 = jax.random.split(jax.random.PRNGKey(1))
    B2, K2, O2 = 300, 200, 5
    x2 = jax.random.normal(kx2, (B2, K2), jnp.float32)
    p2 = init_params(kp2, K2, O2)
    y2 = jax.block_until_ready(linear_with_submodule(x2, *p2))
    r2 = _reference(x2, *p2)
    assert y2.shape == (B2, O2)
    assert jnp.allclose(y2, r2, atol=1e-3, rtol=1e-3), float(jnp.max(jnp.abs(y2 - r2)))

    # Case 3: exercises the tiled (batch, N, K) grid path with a multi-tile
    # K reduction and a multi-tile output dimension.
    kx3, kp3 = jax.random.split(jax.random.PRNGKey(2))
    B3, K3, O3 = 130, 1300, 600
    x3 = jax.random.normal(kx3, (B3, K3), jnp.float32)
    p3 = init_params(kp3, K3, O3)
    y3 = jax.block_until_ready(linear_with_submodule(x3, *p3))
    r3 = _reference(x3, *p3)
    assert y3.shape == (B3, O3)
    assert jnp.allclose(y3, r3, atol=2e-3, rtol=2e-3), float(jnp.max(jnp.abs(y3 - r3)))

    print("KERNEL_OK")
</pallas_src>

<mosaic_0001>
module attributes {stable_mosaic.version = 11 : i64} {
  func.func @_single_block_kernel(%arg0: memref<8x128xf32, #tpu.memory_space<vmem>>, %arg1: memref<128x128xf32, #tpu.memory_space<vmem>>, %arg2: memref<1x128xf32, #tpu.memory_space<vmem>>, %arg3: memref<8x128xf32, #tpu.memory_space<vmem>>) attributes {dimension_semantics = [], scalar_prefetch = 0 : i64, scratch_operands = 0 : i64, tpu.core_type = #tpu.core_type<tc>} {
    %c0 = arith.constant 0 : index
    %c0_0 = arith.constant 0 : index
    %0 = vector.load %arg0[%c0, %c0_0] : memref<8x128xf32, #tpu.memory_space<vmem>>, vector<8x128xf32>
    %c0_1 = arith.constant 0 : index
    %c0_2 = arith.constant 0 : index
    %1 = vector.load %arg1[%c0_1, %c0_2] : memref<128x128xf32, #tpu.memory_space<vmem>>, vector<128x128xf32>
    %cst = arith.constant dense<0.000000e+00> : vector<8x128xf32>
    %2 = tpu.matmul %0, %1, %cst {dimension_numbers = #tpu.dot_dimension_numbers<[1], [0], [0], [1], [0, 0, 1, 1], [], []>} : vector<8x128xf32>, vector<128x128xf32>, vector<8x128xf32> -> vector<8x128xf32>
    %c0_3 = arith.constant 0 : index
    %c0_4 = arith.constant 0 : index
    %3 = vector.load %arg2[%c0_3, %c0_4] : memref<1x128xf32, #tpu.memory_space<vmem>>, vector<1x128xf32>
    %4 = vector.broadcast %3 : vector<1x128xf32> to vector<8x128xf32>
    %5 = arith.addf %2, %4 : vector<8x128xf32>
    %c0_5 = arith.constant 0 : index
    %c0_6 = arith.constant 0 : index
    %6 = vector.load %arg3[%c0_5, %c0_6] : memref<8x128xf32, #tpu.memory_space<vmem>>, vector<8x128xf32>
    tpu.vector_store %arg3[%c0_5, %c0_6], %5 {strides = array<i32>} : memref<8x128xf32, #tpu.memory_space<vmem>>, vector<8x128xf32>,
    return
  }
}

</mosaic_0001>

<bundles_post_ra>
// kernel: forward.1
= control target key start
LH: loop header
LB: loop body
LE: loop exit
PB: predicated region body
PF: predicated region fallthrough
CT: control target
= control target key end

     0   :  { %8 = vsyncpa [#allocation3], 0  ;;  %s235_s12 = smov [#allocation2]   ;;  %s282_s0 = inlined_call_operand.vmem [shape: f32[8,128], index: 0, kind: input, shape index: {}]   ;;  %s283_s1 = inlined_call_operand.hbm [shape: f32[128,128], index: 1, kind: input, shape index: {}]   ;;  %s284_s2 = inlined_call_operand.vmem [shape: f32[1,128], index: 2, kind: input, shape index: {}]   ;;  %s285_s3 = inlined_call_operand.vmem [shape: f32[8,128], index: 3, kind: output, shape index: {}]  }
   0x1   :  { %s16_s13 = sshll.u32 %s235_s12, 4  ;;  %s211_s16 = scalar_lea.hbm %s283_s1, 2048  ;;  %s17_s13 = int_to_ptr.vmem [resolvable:$true] %s16_s13 }
   0x2   :  { %p212_p0 = scmp.ne.s32.totalorder %s283_s1, %s211_s16  ;;  %p215_p1 = scmp.lt.u32.totalorder %s211_s16, %s283_s1 }
   0x4   :  { %p217_p2 = pnand %p215_p1, %p212_p0 }
   0x6   :  { %220 = shalt.err (!%p217_p2)
}
   0x7   :  { %s221_s21 = scalar_lea.vmem %s17_s13, 2048  ;;  %p226_p4 = scmp.lt.s32.totalorder %s17_s13, %s17_s13 }
   0x8   :  { %p222_p3 = scmp.ne.s32.totalorder %s17_s13, %s221_s21  ;;  %p227_p5 = scmp.lt.s32.totalorder %s221_s21, %s221_s21 }
   0xa   :  { %p228_p6 = por %p227_p5, %p226_p4 }
   0xc   :  { %p229_p7 = pnand %p228_p6, %p222_p3 }
   0xe   :  { %232 = shalt.err (!%p229_p7)
}
   0xf   :  { %s236_s22 = smov 128   ;;  %s237_s23 = smov 8  }
  0x10   :  { %22 = dma.hbm_to_vmem [thread:$0]  %s283_s1, 2048, %s17_s13, [#allocation3], %s236_s22, %s236_s22, %s237_s23  }
  0x11   :  { %233 = dma.done.wait [#allocation3], 2048  }
  0x12   :  { %234 = vsyncadd [#allocation3], 4294965248  ;;  %v238_v0 = vmov 0.0|0.0   ;;  %vm239_vm0 = vmmov 0   ;;  %v240_v1 = vmov 0.0   ;;  %v29_v2 = vld [vmem:[#allocation2] sm:$0xff] }
  0x13   :  { %181 = vmatprep.subr.bf16.mxu0 %v238_v0  ;;  %178 = vmatprep.mubr.msk.f32.mxu0 %vm239_vm0, %v240_v1  ;;  %v30_v3 = vld [vmem:[#allocation2 + $0x8] sm:$0xff]  ;;  %v31_v4 = vld [vmem:[#allocation2 + $0x10] sm:$0xff]  ;;  %v32_v6 = vld [vmem:[#allocation2 + $0x18] sm:$0xff] }
  0x14   :  { %v182_v5 = vpack.c.bf16 %v30_v3, %v29_v2  ;;  %v185_v7 = vpack.c.bf16 %v32_v6, %v31_v4  ;;  %v33_v8 = vld [vmem:[#allocation2 + $0x20] sm:$0xff]  ;;  %v34_v9 = vld [vmem:[#allocation2 + $0x28] sm:$0xff]  ;;  %v35_v11 = vld [vmem:[#allocation2 + $0x30] sm:$0xff] }
  0x15   :  { %v188_v10 = vpack.c.bf16 %v34_v9, %v33_v8  ;;  %v36_v12 = vld [vmem:[#allocation2 + $0x38] sm:$0xff]  ;;  %v37_v14 = vld [vmem:[#allocation2 + $0x40] sm:$0xff]  ;;  %v38_v15 = vld [vmem:[#allocation2 + $0x48] sm:$0xff] }
  0x16   :  { %183 = vmatpush3.bf16.msra.mxu0 %v182_v5  ;;  %v191_v13 = vpack.c.bf16 %v36_v12, %v35_v11  ;;  %v194_v16 = vpack.c.bf16 %v38_v15, %v37_v14  ;;  %v39_v17 = vld [vmem:[#allocation2 + $0x50] sm:$0xff]  ;;  %v40_v18 = vld [vmem:[#allocation2 + $0x58] sm:$0xff]  ;;  %v41_v20 = vld [vmem:[#allocation2 + $0x60] sm:$0xff] }
  0x17   :  { %184 = vmatprep.subr.bf16.mxu0 %v238_v0  ;;  %v197_v19 = vpack.c.bf16 %v40_v18, %v39_v17  ;;  %v42_v21 = vld [vmem:[#allocation2 + $0x68] sm:$0xff]  ;;  %v43_v23 = vld [vmem:[#allocation2 + $0x70] sm:$0xff]  ;;  %v44_v24 = vld [vmem:[#allocation2 + $0x78] sm:$0xff] }
  0x18   :  { %v200_v22 = vpack.c.bf16 %v42_v21, %v41_v20  ;;  %v203_v25 = vpack.c.bf16 %v44_v24, %v43_v23  ;;  %v28_v26 = vld [vmem:[%s282_s0] sm:$0xff] }
  0x19   :  { %v128_v27 = vld [vmem:[%s284_s2] ss:$0 sm:$0xff] }
  0x1a   :  { %186 = vmatpush3.bf16.msra.mxu0 %v185_v7 }
  0x1b   :  { %187 = vmatprep.subr.bf16.mxu0 %v238_v0 }
  0x1e   :  { %189 = vmatpush3.bf16.msra.mxu0 %v188_v10 }
  0x1f   :  { %190 = vmatprep.subr.bf16.mxu0 %v238_v0 }
  0x22   :  { %192 = vmatpush3.bf16.msra.mxu0 %v191_v13 }
  0x23   :  { %193 = vmatprep.subr.bf16.mxu0 %v238_v0 }
  0x26   :  { %195 = vmatpush3.bf16.msra.mxu0 %v194_v16 }
  0x27   :  { %196 = vmatprep.subr.bf16.mxu0 %v238_v0 }
  0x2a   :  { %198 = vmatpush3.bf16.msra.mxu0 %v197_v19 }
  0x2b   :  { %199 = vmatprep.subr.bf16.mxu0 %v238_v0 }
  0x2e   :  { %201 = vmatpush3.bf16.msra.mxu0 %v200_v22 }
  0x2f   :  { %202 = vmatprep.subr.bf16.mxu0 %v238_v0 }
  0x32   :  { %204 = vmatpush3.bf16.msra.mxu0 %v203_v25 }
  0x35   :  { %179 = vmatmul.mubr.f32.vlgmr.msra.gmra.mrb[0].mxu0 %v28_v26 }
 0x108   :  { %v118_v28 = vpop.f32.mrb[0].mxu0 }
 0x109   :  { %v119_v29 = vadd.f32 %v128_v27, %v118_v28  ;;  %v180_v30 = vpop.f32.mrb[1].mxu0 }
 0x10b   :  { %122 = vst [vmem:[%s285_s3] sm:$0xff] %v119_v29 }
 0x10c   :  { %127 = vsyncpa [#allocation3], 1 }

</bundles_post_ra>
